<compile_context>
chip_gen: v7x
topology: tpu7x:2x2x1
jax: 0.10.0
libtpu: 0.0.40
codegen_flags: <defaults>
</compile_context>

<pallas_src>
import jax
import jax.numpy as jnp
from jax.experimental import pallas as pl
from jax.experimental.pallas import tpu as pltpu


def _add_kernel(x_ref, p_ref, o_ref):
    # Add in the promoted dtype (VPU), round once on the way out.
    o_ref[...] = (x_ref[...] + p_ref[...]).astype(o_ref.dtype)


def _vmem_capacity_bytes():
    # Conservative fallback (v7x-safe settings also work on v5e/v6e).
    try:
        return int(pltpu.get_tpu_info().vmem_capacity_bytes)
    except Exception:
        return 64 * 1024 * 1024


def _pallas_add(x2d, p2d, *, donate_input=False):
    """Streaming (rows, lane_w) add; lane_w is a multiple of 128."""
    rows, lane_w = x2d.shape
    x_isz = jnp.dtype(x2d.dtype).itemsize
    p_isz = jnp.dtype(p2d.dtype).itemsize

    vmem_bytes = _vmem_capacity_bytes()
    multi_tc = vmem_bytes <= 64 * 1024 * 1024  # v7x-like: 64 MiB VMEM, 2 TCs.
    if multi_tc:
        target_block_bytes = 4 * 1024 * 1024   # 3 ops x 2 bufs x 4 MiB = 24 MiB
        vmem_limit = 40 * 1024 * 1024
    else:
        target_block_bytes = 8 * 1024 * 1024   # 3 ops x 2 bufs x 8 MiB = 48 MiB
        vmem_limit = 80 * 1024 * 1024

    # Dtype-native sublane multiple (8 for f32, 16 for bf16, 32 for int8),
    # driven by the narrowest operand so packed tiles stay aligned.
    sublane = max(8, 32 // min(x_isz, p_isz))

    br = target_block_bytes // (lane_w * x_isz)
    br = max(sublane, (br // sublane) * sublane)
    if br >= rows:
        if multi_tc and rows >= 2 * sublane:
            # Force >=2 grid steps so both v7x TensorCores get work.
            half = (rows + 1) // 2
            br = ((half + sublane - 1) // sublane) * sublane
        else:
            br = rows  # full-extent block (always legal)

    grid = (pl.cdiv(rows, br),)

    n = rows * lane_w
    cost = pl.CostEstimate(
        flops=n,
        transcendentals=0,
        bytes_accessed=n * (x_isz + p_isz + x_isz),
    )

    return pl.pallas_call(
        _add_kernel,
        out_shape=jax.ShapeDtypeStruct((rows, lane_w), x2d.dtype),
        grid=grid,
        in_specs=[
            pl.BlockSpec((br, lane_w), lambda i: (i, 0)),
            pl.BlockSpec((br, lane_w), lambda i: (i, 0)),
        ],
        out_specs=pl.BlockSpec((br, lane_w), lambda i: (i, 0)),
        compiler_params=pltpu.CompilerParams(
            dimension_semantics=("parallel",),
            vmem_limit_bytes=vmem_limit,
        ),
        cost_estimate=cost,
        # Caller hazard: with donate_input=True the output may alias x's HBM
        # buffer, so batched_data must not be reused afterwards.
        input_output_aliases={0: 0} if donate_input else {},
    )(x2d, p2d)


def base_model_forward(batched_data, perturb=None, *, donate_input=False,
                       min_pallas_bytes=1 << 20):
    """Pallas 'forward' for BaseModel.

    batched_data: jnp.ndarray (any shape), float32/bf16/etc.
    perturb:      optional jnp.ndarray; added to batched_data when given.
    Returns an array with the same shape/dtype as batched_data.
    """
    x = batched_data

    # --- None path: pure pass-through; no kernel launch, no extra HBM pass ---
    if perturb is None:
        return x

    perturb = jnp.asarray(perturb)

    # --- Mismatched shapes: XLA fuses the broadcast into the add (one pass
    #     over x + one small read of perturb); materializing broadcast_to and
    #     re-reading it in a kernel would roughly double the HBM traffic. ---
    if jnp.shape(perturb) != jnp.shape(x):
        return (x + perturb).astype(x.dtype)

    total = x.size
    itemsize = jnp.dtype(x.dtype).itemsize

    # --- Tiny inputs: fixed pallas_call/reshape overhead dominates and XLA's
    #     fused add is already at roofline there. ---
    if total * itemsize < min_pallas_bytes or total < 8 * 128:
        return (x + perturb).astype(x.dtype)

    orig_shape = x.shape
    xf = x.reshape(-1)
    pf = perturb.reshape(-1)

    # Widest lane dim that divides total exactly (full-width vst stores).
    lane_w = None
    for cand in (1024, 512, 256, 128):
        if total % cand == 0:
            lane_w = cand
            break

    if lane_w is not None:
        out2d = _pallas_add(xf.reshape(-1, lane_w), pf.reshape(-1, lane_w),
                            donate_input=donate_input)
        return out2d.reshape(orig_shape)

    # --- Rare unaligned case: no jnp.pad of both operands.  Kernel on the
    #     128-aligned prefix; <128-element tail via a tiny XLA add. ---
    main = (total // 128) * 128
    out_main = _pallas_add(xf[:main].reshape(-1, 128),
                           pf[:main].reshape(-1, 128))
    out_tail = (xf[main:] + pf[main:]).astype(x.dtype)
    return jnp.concatenate([out_main.reshape(-1), out_tail]).reshape(orig_shape)


if __name__ == "__main__":
    key = jax.random.PRNGKey(0)
    kx, kp = jax.random.split(key)

    # Small NCHW-style batched feature tensor consistent with the module.
    x = jax.random.normal(kx, (2, 4, 16, 16), dtype=jnp.float32)
    perturb = 0.01 * jax.random.normal(kp, (2, 4, 16, 16), dtype=jnp.float32)
    ref = x + perturb

    # Path 1: perturb given, forced through the Pallas kernel (min_pallas_bytes=0
    # disables the tiny-input short-circuit so the kernel actually runs here).
    out = jax.block_until_ready(base_model_forward(x, perturb, min_pallas_bytes=0))
    assert out.shape == x.shape and out.dtype == x.dtype
    assert jnp.allclose(out, ref, atol=1e-6), "mismatch vs reference (perturb path)"

    # Path 2: mixed dtypes (bf16 activations + f32 perturb) -> promotion happens
    # inside the kernel, output rounded once to x.dtype.
    xb = x.astype(jnp.bfloat16)
    outb = jax.block_until_ready(base_model_forward(xb, perturb, min_pallas_bytes=0))
    refb = (xb.astype(jnp.float32) + perturb).astype(jnp.bfloat16)
    assert outb.shape == xb.shape and outb.dtype == jnp.bfloat16
    assert jnp.allclose(outb.astype(jnp.float32), refb.astype(jnp.float32),
                        atol=1e-2), "mismatch vs reference (mixed-dtype path)"

    # Path 3: default tiny-input short-circuit and perturb=None pass-through.
    out_small = jax.block_until_ready(base_model_forward(x, perturb))
    assert jnp.allclose(out_small, ref, atol=1e-6), "mismatch (short-circuit path)"
    out_none = jax.block_until_ready(base_model_forward(x))
    assert jnp.array_equal(out_none, x), "mismatch vs reference (None path)"

    print("KERNEL_OK")
</pallas_src>

<mosaic_0001>
module attributes {stable_mosaic.version = 11 : i64} {
  func.func @_add_kernel(%arg0: i32, %arg1: memref<2x1024xf32, #tpu.memory_space<vmem>>, %arg2: memref<2x1024xf32, #tpu.memory_space<vmem>>, %arg3: memref<2x1024xf32, #tpu.memory_space<vmem>>) attributes {dimension_semantics = [#tpu.dimension_semantics<parallel>], iteration_bounds = array<i64: 1>, scalar_prefetch = 0 : i64, scratch_operands = 0 : i64, tpu.core_type = #tpu.core_type<tc>, window_params = [{transform_indices = @transform_0, window_bounds = array<i64: 2, 1024>}, {transform_indices = @transform_1, window_bounds = array<i64: 2, 1024>}, {transform_indices = @transform_2, window_bounds = array<i64: 2, 1024>}]} {
    %c0 = arith.constant 0 : index
    %c0_0 = arith.constant 0 : index
    %0 = vector.load %arg1[%c0, %c0_0] : memref<2x1024xf32, #tpu.memory_space<vmem>>, vector<2x1024xf32>
    %c0_1 = arith.constant 0 : index
    %c0_2 = arith.constant 0 : index
    %1 = vector.load %arg2[%c0_1, %c0_2] : memref<2x1024xf32, #tpu.memory_space<vmem>>, vector<2x1024xf32>
    %2 = arith.addf %0, %1 : vector<2x1024xf32>
    %c0_3 = arith.constant 0 : index
    %c0_4 = arith.constant 0 : index
    %3 = vector.load %arg3[%c0_3, %c0_4] : memref<2x1024xf32, #tpu.memory_space<vmem>>, vector<2x1024xf32>
    tpu.vector_store %arg3[%c0_3, %c0_4], %2 {strides = array<i32>} : memref<2x1024xf32, #tpu.memory_space<vmem>>, vector<2x1024xf32>,
    return
  }
  func.func @transform_0(%arg0: i32) -> (i32, i32) {
    %c0_i32 = arith.constant 0 : i32
    %c0_i32_0 = arith.constant 0 : i32
    return %arg0, %c0_i32 : i32, i32
  }
  func.func @transform_1(%arg0: i32) -> (i32, i32) {
    %c0_i32 = arith.constant 0 : i32
    %c0_i32_0 = arith.constant 0 : i32
    return %arg0, %c0_i32 : i32, i32
  }
  func.func @transform_2(%arg0: i32) -> (i32, i32) {
    %c0_i32 = arith.constant 0 : i32
    %c0_i32_0 = arith.constant 0 : i32
    return %arg0, %c0_i32 : i32, i32
  }
}

</mosaic_0001>

<bundles_post_ra>
// kernel: tpu_custom_call.1
= control target key start
LH: loop header
LB: loop body
LE: loop exit
PB: predicated region body
PF: predicated region fallthrough
CT: control target
= control target key end

     0   :  { %7 = vsyncpa [#allocation3], 0  ;;  %s189_s0 = inlined_call_operand.hbm [shape: f32[2,1024], index: 0, kind: input, shape index: {}]   ;;  %s190_s1 = inlined_call_operand.hbm [shape: f32[2,1024], index: 1, kind: input, shape index: {}]   ;;  %s191_s2 = inlined_call_operand.hbm [shape: f32[2,1024], index: 2, kind: output, shape index: {}]  }
   0x1   :  { %8 = vsyncpa [#allocation6], 0 }
   0x2   :  { %9 = vsyncpa [#allocation4], 0  ;;  %s135_s9 = smov [#allocation2]   ;;  %s136_s11 = smov [#allocation5]  }
   0x3   :  { %s16_s10 = sshll.u32 %s135_s9, 4  ;;  %s26_s12 = sshll.u32 %s136_s11, 4  ;;  %s17_s10 = int_to_ptr.vmem [resolvable:$true] %s16_s10  ;;  %s27_s12 = int_to_ptr.vmem [resolvable:$true] %s26_s12 }
   0x4   :  { %s63_s15 = scalar_lea.hbm %s189_s0, 256 }
   0x5   :  { %p64_p0 = scmp.ne.s32.totalorder %s189_s0, %s63_s15  ;;  %p67_p1 = scmp.lt.u32.totalorder %s63_s15, %s189_s0 }
   0x7   :  { %p69_p2 = pnand %p67_p1, %p64_p0 }
   0x9   :  { %72 = shalt.err (!%p69_p2)
}
   0xa   :  { %s73_s20 = scalar_lea.vmem %s17_s10, 256  ;;  %p78_p4 = scmp.lt.s32.totalorder %s17_s10, %s17_s10 }
   0xb   :  { %p74_p3 = scmp.ne.s32.totalorder %s17_s10, %s73_s20  ;;  %p79_p5 = scmp.lt.s32.totalorder %s73_s20, %s73_s20 }
   0xd   :  { %p80_p6 = por %p79_p5, %p78_p4 }
   0xf   :  { %p81_p7 = pnand %p80_p6, %p74_p3 }
  0x11   :  { %84 = shalt.err (!%p81_p7)
}
  0x12   :  { %19 = dma.hbm_to_vmem [thread:$0]  %s189_s0, 256, %s17_s10, [#allocation3]  }
  0x13   :  { %s85_s25 = scalar_lea.hbm %s190_s1, 256 }
  0x14   :  { %p86_p8 = scmp.ne.s32.totalorder %s190_s1, %s85_s25  ;;  %p89_p9 = scmp.lt.u32.totalorder %s85_s25, %s190_s1 }
  0x16   :  { %p91_p10 = pnand %p89_p9, %p86_p8 }
  0x18   :  { %94 = shalt.err (!%p91_p10)
}
  0x19   :  { %s95_s30 = scalar_lea.vmem %s27_s12, 256  ;;  %p100_p12 = scmp.lt.s32.totalorder %s27_s12, %s27_s12 }
  0x1a   :  { %p96_p11 = scmp.ne.s32.totalorder %s27_s12, %s95_s30  ;;  %p101_p13 = scmp.lt.s32.totalorder %s95_s30, %s95_s30 }
  0x1c   :  { %p102_p0 = por %p101_p13, %p100_p12 }
  0x1e   :  { %p103_p1 = pnand %p102_p0, %p96_p11 }
  0x20   :  { %106 = shalt.err (!%p103_p1)
}
  0x21   :  { %29 = dma.hbm_to_vmem [thread:$0]  %s190_s1, 256, %s27_s12, [#allocation6]  }
  0x22   :  { %129 = dma.done.wait [#allocation3], 256  }
  0x23   :  { %130 = vsyncadd [#allocation3], 4294967040 }
  0x24   :  { %131 = dma.done.wait [#allocation6], 256  }
  0x25   :  { %132 = vsyncadd [#allocation6], 4294967040  ;;  %s137_s4 = smov [#allocation7]   ;;  %v36_v0 = vld [vmem:[#allocation2] sm:$0xff]  ;;  %v38_v1 = vld [vmem:[#allocation5] sm:$0xff] }
  0x26   :  { %s50_s5 = sshll.u32 %s137_s4, 4  ;;  %v37_v2 = vld [vmem:[#allocation2 + $0x8] sm:$0xff]  ;;  %v40_v3 = vadd.f32 %v38_v1, %v36_v0  ;;  %v39_v4 = vld [vmem:[#allocation5 + $0x8] sm:$0xff]  ;;  %s51_s5 = int_to_ptr.vmem [resolvable:$true] %s50_s5 }
  0x27   :  { %v41_v5 = vadd.f32 %v39_v4, %v37_v2  ;;  %s107_s6 = scalar_lea.vmem %s51_s5, 256  ;;  %p112_p3 = scmp.lt.s32.totalorder %s51_s5, %s51_s5 }
  0x28   :  { %42 = vst [vmem:[#allocation7] sm:$0xff] %v40_v3  ;;  %p108_p2 = scmp.ne.s32.totalorder %s51_s5, %s107_s6  ;;  %p113_p4 = scmp.lt.s32.totalorder %s107_s6, %s107_s6 }
  0x29   :  { %43 = vst [vmem:[#allocation7 + $0x8] sm:$0xff] %v41_v5 }
  0x2a   :  { %p114_p5 = por %p113_p4, %p112_p3 }
  0x2c   :  { %p115_p6 = pnand %p114_p5, %p108_p2 }
  0x2e   :  { %118 = shalt.err (!%p115_p6)
}
  0x2f   :  { %s119_s8 = scalar_lea.hbm %s191_s2, 256 }
  0x30   :  { %p120_p7 = scmp.ne.s32.totalorder %s191_s2, %s119_s8  ;;  %p123_p8 = scmp.lt.u32.totalorder %s119_s8, %s191_s2 }
  0x32   :  { %p125_p9 = pnand %p123_p8, %p120_p7 }
  0x34   :  { %128 = shalt.err (!%p125_p9)
}
  0x35   :  { %53 = dma.vmem_to_hbm [thread:$0]  %s51_s5, 256, %s191_s2, [#allocation4]  }
  0x36   :  { %133 = dma.done.wait [#allocation4], 256  }
  0x37   :  { %134 = vsyncadd [#allocation4], 4294967040 }
  0x38   :  { %57 = vsyncpa [#allocation3], 1 }
  0x39   :  { %58 = vsyncpa [#allocation6], 1 }
  0x3a   :  { %59 = vsyncpa [#allocation4], 1 }

</bundles_post_ra>
